<compile_context>
chip_gen: v5e
topology: v5e:2x2
jax: 0.10.0
libtpu: 0.0.40
codegen_flags: <defaults>
</compile_context>

<pallas_src>
import numpy as np
import jax
import jax.numpy as jnp
from jax.experimental import pallas as pl
from jax.experimental.pallas import tpu as pltpu

NUM_FREQS = 20
MAX_FREQ = 10.0
# Deterministic "parameter" from the module __init__ (requires_grad=False).
FREQS = (2.0 ** np.linspace(0.0, MAX_FREQ, NUM_FREQS).astype(np.float32))


def _make_kernel(include_in: bool):
    def kernel(x_ref, f_ref, o_ref):
        """x_ref: (tm, C) f32.   f_ref: (1, F*C) f32, each freq repeated C times.
        o_ref: (tm, C*(include_in + 2*F)) f32, laid out [x? | sin-block | cos-block]."""
        x = x_ref[...]                          # (tm, C)
        freqs_fc = f_ref[...]                   # (1, F*C): [f0]*C, [f1]*C, ...
        C = x.shape[1]
        FC = freqs_fc.shape[1]
        F = FC // C
        # Lane-dense compute: replicate the C channels once per frequency so the
        # 2*F transcendentals per element run over F*C lanes instead of C lanes.
        x_fc = jnp.tile(x, (1, F))              # (tm, F*C): x_fc[:, j*C + c] = x[:, c]
        xf = x_fc * freqs_fc                    # (tm, F*C)
        base = C if include_in else 0
        if include_in:
            o_ref[:, :C] = x
        # Frequency-major ordering matches
        # torch.cat([x, sin(x*f0), ..., sin(x*f19), cos(x*f0), ...], dim=-1).
        o_ref[:, base:base + FC] = jnp.sin(xf)
        o_ref[:, base + FC:base + 2 * FC] = jnp.cos(xf)

    return kernel


def _round_up(n, m):
    return ((n + m - 1) // m) * m


def embedding_module_log(x, num_freqs=NUM_FREQS, max_freq=MAX_FREQ,
                         include_in=True):
    """JAX wrapper: flatten leading dims to rows, tile rows, run the Pallas kernel."""
    orig_shape = x.shape
    C = int(orig_shape[-1])
    x2 = x.reshape(-1, C).astype(jnp.float32)
    N = x2.shape[0]
    F = int(num_freqs)
    FC = F * C
    Cout = C * ((1 if include_in else 0) + 2 * F)

    # Frequencies repeated per channel, passed as a (1, F*C) kernel input.
    freqs = (2.0 ** np.linspace(0.0, float(max_freq), F)).astype(np.float32)
    freqs_fc = jnp.asarray(np.repeat(freqs, C).reshape(1, FC), dtype=jnp.float32)

    # Large row tile to amortize per-grid-step overhead.  At tm=4096 the output
    # tile is ~2.7 MiB (x2 double-buffered ~5.4 MiB), comfortably under the
    # scoped-VMEM default on every generation.  Small inputs shrink tm so we
    # never compute far beyond N rows.
    tm = min(4096, _round_up(N, 8))
    grid = (pl.cdiv(N, tm),)

    out = pl.pallas_call(
        _make_kernel(bool(include_in)),
        out_shape=jax.ShapeDtypeStruct((N, Cout), jnp.float32),
        grid=grid,
        in_specs=[
            pl.BlockSpec((tm, C), lambda i: (i, 0)),
            pl.BlockSpec((1, FC), lambda i: (0, 0)),
        ],
        out_specs=pl.BlockSpec((tm, Cout), lambda i: (i, 0)),
        compiler_params=pltpu.CompilerParams(
            dimension_semantics=("parallel",)),
        cost_estimate=pl.CostEstimate(
            flops=2 * N * FC,                 # the x * f multiplies
            transcendentals=2 * N * FC,       # sin + cos
            bytes_accessed=4 * N * (C + Cout) + 4 * FC),
    )(x2, freqs_fc)

    return out.reshape(*orig_shape[:-1], Cout)


def _reference(x, include_in=True):
    """Pure-JAX reference mirroring the PyTorch forward (sanity check)."""
    out_list = [x] if include_in else []
    for func in (jnp.sin, jnp.cos):
        for f in FREQS:
            out_list.append(func(x * f))
    return jnp.concatenate(out_list, axis=-1)


if __name__ == "__main__":
    key = jax.random.PRNGKey(0)
    # small shapes: batch=2, seq=8, channels=4 -> output channels = 4*(1+2*20)=164
    x = jax.random.normal(key, (2, 8, 4), dtype=jnp.float32)

    y = embedding_module_log(x)
    y = jax.block_until_ready(y)

    y_ref = _reference(x)
    assert y.shape == (2, 8, 164), y.shape
    # sin/cos args reach |x|*2^10; tolerance covers transcendental-impl ULP
    # differences at large arguments (semantics identical to the reference).
    np.testing.assert_allclose(np.asarray(y), np.asarray(y_ref),
                               rtol=2e-3, atol=2e-3)

    print("KERNEL_OK")
</pallas_src>

<mosaic_0001>
module attributes {stable_mosaic.version = 11 : i64} {
  func.func @kernel(%arg0: i32, %arg1: memref<16x4xf32, #tpu.memory_space<vmem>>, %arg2: memref<1x80xf32, #tpu.memory_space<vmem>>, %arg3: memref<16x164xf32, #tpu.memory_space<vmem>>) attributes {dimension_semantics = [#tpu.dimension_semantics<parallel>], iteration_bounds = array<i64: 1>, scalar_prefetch = 0 : i64, scratch_operands = 0 : i64, tpu.core_type = #tpu.core_type<tc>, window_params = [{transform_indices = @transform_0, window_bounds = array<i64: 16, 4>}, {pipeline_mode = #tpu.pipeline_mode<synchronous>, transform_indices = @transform_1, window_bounds = array<i64: 1, 80>}, {transform_indices = @transform_2, window_bounds = array<i64: 16, 164>}]} {
    %c0 = arith.constant 0 : index
    %c0_0 = arith.constant 0 : index
    %0 = vector.load %arg1[%c0, %c0_0] : memref<16x4xf32, #tpu.memory_space<vmem>>, vector<16x4xf32>
    %c0_1 = arith.constant 0 : index
    %c0_2 = arith.constant 0 : index
    %1 = vector.load %arg2[%c0_1, %c0_2] : memref<1x80xf32, #tpu.memory_space<vmem>>, vector<1x80xf32>
    %2 = tpu.concatenate %0, %0, %0, %0, %0, %0, %0, %0, %0, %0, %0, %0, %0, %0, %0, %0, %0, %0, %0, %0 in 1 : vector<16x4xf32>, vector<16x4xf32>, vector<16x4xf32>, vector<16x4xf32>, vector<16x4xf32>, vector<16x4xf32>, vector<16x4xf32>, vector<16x4xf32>, vector<16x4xf32>, vector<16x4xf32>, vector<16x4xf32>, vector<16x4xf32>, vector<16x4xf32>, vector<16x4xf32>, vector<16x4xf32>, vector<16x4xf32>, vector<16x4xf32>, vector<16x4xf32>, vector<16x4xf32>, vector<16x4xf32> -> vector<16x80xf32>
    %3 = vector.broadcast %1 : vector<1x80xf32> to vector<16x80xf32>
    %4 = arith.mulf %2, %3 : vector<16x80xf32>
    %c0_3 = arith.constant 0 : index
    %c0_4 = arith.constant 0 : index
    %5 = vector.load %arg3[%c0_3, %c0_4] : memref<16x164xf32, #tpu.memory_space<vmem>>, vector<16x4xf32>
    tpu.vector_store %arg3[%c0_3, %c0_4], %0 {strides = array<i32>} : memref<16x164xf32, #tpu.memory_space<vmem>>, vector<16x4xf32>,
    %6 = math.sin %4 : vector<16x80xf32>
    %c0_5 = arith.constant 0 : index
    %c4 = arith.constant 4 : index
    %7 = vector.load %arg3[%c0_5, %c4] : memref<16x164xf32, #tpu.memory_space<vmem>>, vector<16x80xf32>
    tpu.vector_store %arg3[%c0_5, %c4], %6 {strides = array<i32>} : memref<16x164xf32, #tpu.memory_space<vmem>>, vector<16x80xf32>,
    %8 = math.cos %4 : vector<16x80xf32>
    %c0_6 = arith.constant 0 : index
    %c84 = arith.constant 84 : index
    %9 = vector.load %arg3[%c0_6, %c84] : memref<16x164xf32, #tpu.memory_space<vmem>>, vector<16x80xf32>
    tpu.vector_store %arg3[%c0_6, %c84], %8 {strides = array<i32>} : memref<16x164xf32, #tpu.memory_space<vmem>>, vector<16x80xf32>,
    return
  }
  func.func @transform_0(%arg0: i32) -> (i32, i32) {
    %c0_i32 = arith.constant 0 : i32
    %c0_i32_0 = arith.constant 0 : i32
    return %arg0, %c0_i32 : i32, i32
  }
  func.func @transform_1(%arg0: i32) -> (i32, i32) {
    %c0_i32 = arith.constant 0 : i32
    %c0_i32_0 = arith.constant 0 : i32
    %c0_i32_1 = arith.constant 0 : i32
    return %c0_i32, %c0_i32_0 : i32, i32
  }
  func.func @transform_2(%arg0: i32) -> (i32, i32) {
    %c0_i32 = arith.constant 0 : i32
    %c0_i32_0 = arith.constant 0 : i32
    return %arg0, %c0_i32 : i32, i32
  }
}

</mosaic_0001>

<bundles_post_ra>
// kernel: tpu_custom_call.1
= control target key start
LH: loop header
LB: loop body
LE: loop exit
PB: predicated region body
PF: predicated region fallthrough
CT: control target
= control target key end

     0   :  { %s923_s11 = smov 8   ;;  %s924_s12 = smov 4   ;;  %s1241_s0 = inlined_call_operand.vmem [shape: f32[16,4], index: 0, kind: input, shape index: {}]   ;;  %s1242_s1 = inlined_call_operand.vmem [shape: f32[1,80], index: 1, kind: input, shape index: {}]   ;;  %s1243_s2 = inlined_call_operand.hbm [shape: f32[16,164], index: 2, kind: output, shape index: {}]  }
   0x1   :  { %v970_v0 = vld [vmem:[%s1241_s0] sm:$0xff] }
   0x2   :  { %23 = vrot.lane.b32.xlu1 %v970_v0, %s923_s11  ;;  %17 = vrot.lane.b32.xlu0 %v970_v0, %s924_s12 }
   0x3   :  { %7 = vsyncpa [#allocation3], 0  ;;  %s925_s13 = smov 12   ;;  %v979_v1 = vld [vmem:[%s1241_s0 + $0x8] sm:$0xff]  ;;  %s926_s16 = smov 16   ;;  %vm131_vm0 = vcmask 31744  }
   0x4   :  { %29 = vrot.lane.b32.xlu2 %v970_v0, %s925_s13  ;;  %s927_s17 = smov 20   ;;  %s928_s18 = smov 24   ;;  %193 = vst.msk [vmem:[#allocation2] sm:$0xff] %vm131_vm0, %v970_v0  ;;  %vm134_vm1 = vcmask 64512   ;;  %vm137_vm2 = vcmask 97280   ;;  %vm140_vm3 = vcmask 130048  }
   0x5   :  { %s929_s0 = smov 28   ;;  %s930_s19 = smov 32   ;;  %194 = vst.msk [vmem:[#allocation2 + $0x10] sm:$0xff] %vm131_vm0, %v979_v1  ;;  %vm143_vm4 = vcmask 162816   ;;  %vm146_vm5 = vcmask 195584   ;;  %vm149_vm6 = vcmask 228352  }
   0x6   :  { %s931_s20 = smov 36   ;;  %s932_s21 = smov 40   ;;  %vm152_vm7 = vcmask 261120   ;;  %vm155_vm8 = vcmask 293888   ;;  %vm158_vm9 = vcmask 326656   ;;  %vm161_vm10 = vcmask 359424  }
   0x7   :  { %s933_s22 = smov 44   ;;  %s934_s23 = smov 48   ;;  %vm164_vm11 = vcmask 392192   ;;  %vm167_vm12 = vcmask 424960   ;;  %vm170_vm13 = vcmask 457728   ;;  %vm173_vm14 = vcmask 490496  }
   0x8   :  { %s935_s24 = smov 52   ;;  %s936_s25 = smov 56   ;;  %vm176_vm15 = vcmask 523264  }
   0x9   :  { %s937_s26 = smov 60   ;;  %s938_s27 = smov 64  }
   0xa   :  { %25 = vrot.lane.b32.xlu1 %v979_v1, %s923_s11  ;;  %19 = vrot.lane.b32.xlu0 %v979_v1, %s924_s12  ;;  %s939_s28 = smov 68   ;;  %s940_s29 = smov 72  }
   0xb   :  { %s941_s30 = smov 76   ;;  %s950_s5 = smov [#allocation2]  }
   0xc   :  { %31 = vrot.lane.b32.xlu2 %v979_v1, %s925_s13  ;;  %s841_s6 = sshll.u32 %s950_s5, 4  ;;  %s843_s9 = sshll.u32 %s1243_s2, 4  ;;  %s842_s6 = int_to_ptr.vmem [resolvable:$true] %s841_s6  ;;  %s844_s9 = int_to_ptr.hbm [resolvable:$true] %s843_s9 }
   0xd   :  { %s951_s10 = smov 256  }
  0x12   :  { %37 = vrot.lane.b32.xlu1 %v979_v1, %s926_s16  ;;  %35 = vrot.lane.b32.xlu0 %v970_v0, %s926_s16 }
  0x14   :  { %41 = vrot.lane.b32.xlu2 %v970_v0, %s927_s17 }
  0x1a   :  { %47 = vrot.lane.b32.xlu1 %v970_v0, %s928_s18  ;;  %43 = vrot.lane.b32.xlu0 %v979_v1, %s927_s17 }
  0x1c   :  { %49 = vrot.lane.b32.xlu2 %v979_v1, %s928_s18 }
  0x22   :  { %55 = vrot.lane.b32.xlu1 %v979_v1, %s929_s0  ;;  %53 = vrot.lane.b32.xlu0 %v970_v0, %s929_s0 }
  0x24   :  { %59 = vrot.lane.b32.xlu2 %v970_v0, %s930_s19 }
  0x2a   :  { %65 = vrot.lane.b32.xlu1 %v970_v0, %s931_s20  ;;  %61 = vrot.lane.b32.xlu0 %v979_v1, %s930_s19 }
  0x2c   :  { %67 = vrot.lane.b32.xlu2 %v979_v1, %s931_s20 }
  0x32   :  { %73 = vrot.lane.b32.xlu1 %v979_v1, %s932_s21  ;;  %71 = vrot.lane.b32.xlu0 %v970_v0, %s932_s21 }
  0x34   :  { %77 = vrot.lane.b32.xlu2 %v970_v0, %s933_s22 }
  0x3a   :  { %83 = vrot.lane.b32.xlu1 %v970_v0, %s934_s23  ;;  %79 = vrot.lane.b32.xlu0 %v979_v1, %s933_s22 }
  0x3c   :  { %85 = vrot.lane.b32.xlu2 %v979_v1, %s934_s23 }
  0x42   :  { %91 = vrot.lane.b32.xlu1 %v979_v1, %s935_s24  ;;  %89 = vrot.lane.b32.xlu0 %v970_v0, %s935_s24 }
  0x44   :  { %95 = vrot.lane.b32.xlu2 %v970_v0, %s936_s25 }
  0x4a   :  { %101 = vrot.lane.b32.xlu1 %v970_v0, %s937_s26  ;;  %97 = vrot.lane.b32.xlu0 %v979_v1, %s936_s25 }
  0x4c   :  { %103 = vrot.lane.b32.xlu2 %v979_v1, %s937_s26 }
  0x52   :  { %109 = vrot.lane.b32.xlu1 %v979_v1, %s938_s27  ;;  %107 = vrot.lane.b32.xlu0 %v970_v0, %s938_s27 }
  0x54   :  { %113 = vrot.lane.b32.xlu2 %v970_v0, %s939_s28 }
  0x5a   :  { %119 = vrot.lane.b32.xlu1 %v970_v0, %s940_s29  ;;  %115 = vrot.lane.b32.xlu0 %v979_v1, %s939_s28 }
  0x5c   :  { %121 = vrot.lane.b32.xlu2 %v979_v1, %s940_s29 }
  0x5e   :  { %v30_v2 = vpop.permute.xlu2 %29 }
  0x62   :  { %127 = vrot.lane.b32.xlu1 %v979_v1, %s941_s30  ;;  %125 = vrot.lane.b32.xlu0 %v970_v0, %s941_s30 }
  0x66   :  { %v32_v3 = vpop.permute.xlu2 %31 }
  0x6e   :  { %v42_v9 = vpop.permute.xlu2 %41 }
  0x74   :  { %v24_v4 = vpop.permute.xlu1 %23  ;;  %v18_v5 = vpop.permute.xlu0 %17 }
  0x75   :  { %v132_v6 = vsel %vm131_vm0, %v970_v0, %v18_v5 }
  0x76   :  { %v135_v7 = vsel %vm134_vm1, %v132_v6, %v24_v4  ;;  %v50_v15 = vpop.permute.xlu2 %49 }
  0x77   :  { %v138_v8 = vsel %vm137_vm2, %v135_v7, %v30_v2  ;;  %v896_v7 = vld [vmem:[%s1242_s1] ss:$0 sm:$0xff]  ;;  %s949_s1 = smov 84  }
  0x7c   :  { %v26_v10 = vpop.permute.xlu1 %25  ;;  %v20_v11 = vpop.permute.xlu0 %19 }
  0x7d   :  { %v133_v12 = vsel %vm131_vm0, %v979_v1, %v20_v11  ;;  %vm179_vm0 = vcmask 556032  }
  0x7e   :  { %v136_v13 = vsel %vm134_vm1, %v133_v12, %v26_v10  ;;  %v60_v21 = vpop.permute.xlu2 %59  ;;  %vm182_vm1 = vcmask 588800  }
  0x7f   :  { %v139_v14 = vsel %vm137_vm2, %v136_v13, %v32_v3  ;;  %vm185_vm2 = vcmask 621568  }
  0x84   :  { %v38_v16 = vpop.permute.xlu1 %37  ;;  %v36_v17 = vpop.permute.xlu0 %35 }
  0x85   :  { %v142_v18 = vsel %vm140_vm3, %v139_v14, %v38_v16  ;;  %v141_v19 = vsel %vm140_vm3, %v138_v8, %v36_v17 }
  0x86   :  { %v144_v20 = vsel %vm143_vm4, %v141_v19, %v42_v9  ;;  %v68_v28 = vpop.permute.xlu2 %67 }
  0x8c   :  { %v48_v22 = vpop.permute.xlu1 %47  ;;  %v44_v23 = vpop.permute.xlu0 %43 }
  0x8d   :  { %v147_v24 = vsel %vm146_vm5, %v144_v20, %v48_v22  ;;  %v145_v44 = vsel %vm143_vm4, %v142_v18, %v44_v23 }
  0x8e   :  { %v78_v33 = vpop.permute.xlu2 %77  ;;  %v148_v46 = vsel %vm146_vm5, %v145_v44, %v50_v15 }
  0x94   :  { %v56_v25 = vpop.permute.xlu1 %55  ;;  %v54_v26 = vpop.permute.xlu0 %53 }
  0x95   :  { %v150_v27 = vsel %vm149_vm6, %v147_v24, %v54_v26  ;;  %v151_v47 = vsel %vm149_vm6, %v148_v46, %v56_v25  ;;  %v944_v46 = vmov 1326507024  }
  0x96   :  { %v153_v29 = vsel %vm152_vm7, %v150_v27, %v60_v21  ;;  %v86_v36 = vpop.permute.xlu2 %85 }
  0x9c   :  { %v66_v30 = vpop.permute.xlu1 %65  ;;  %v62_v31 = vpop.permute.xlu0 %61 }
  0x9d   :  { %v156_v32 = vsel %vm155_vm8, %v153_v29, %v66_v30  ;;  %v154_v48 = vsel %vm152_vm7, %v151_v47, %v62_v31 }
  0x9e   :  { %v96_v39 = vpop.permute.xlu2 %95  ;;  %v157_v51 = vsel %vm155_vm8, %v154_v48, %v68_v28 }
  0xa4   :  { %v74_v34 = vpop.permute.xlu1 %73  ;;  %v72_v35 = vpop.permute.xlu0 %71 }
  0xa5   :  { %v160_v52 = vsel %vm158_vm9, %v157_v51, %v74_v34  ;;  %v159_v53 = vsel %vm158_vm9, %v156_v32, %v72_v35 }
  0xa6   :  { %v104_v45 = vpop.permute.xlu2 %103  ;;  %v162_v56 = vsel %vm161_vm10, %v159_v53, %v78_v33 }
  0xac   :  { %v84_v37 = vpop.permute.xlu1 %83  ;;  %v80_v38 = vpop.permute.xlu0 %79 }
  0xad   :  { %v163_v54 = vsel %vm161_vm10, %v160_v52, %v80_v38  ;;  %v165_v57 = vsel %vm164_vm11, %v162_v56, %v84_v37  ;;  %v942_v38 = vmov 2102212464   ;;  %v946_v52 = vmov 2475754826  }
  0xae   :  { %v114_v55 = vpop.permute.xlu2 %113  ;;  %v166_v58 = vsel %vm164_vm11, %v163_v54, %v86_v36 }
  0xb4   :  { %v92_v40 = vpop.permute.xlu1 %91  ;;  %v90_v41 = vpop.permute.xlu0 %89 }
  0xb5   :  { %v169_v59 = vsel %vm167_vm12, %v166_v58, %v92_v40  ;;  %v168_v60 = vsel %vm167_vm12, %v165_v57, %v90_v41  ;;  %v947_v57 = vmov 2131351028  }
  0xb6   :  { %v171_v0 = vsel %vm170_vm13, %v168_v60, %v96_v39  ;;  %v122_v6 = vpop.permute.xlu2 %121 }
  0xbc   :  { %v102_v42 = vpop.permute.xlu1 %101  ;;  %v98_v43 = vpop.permute.xlu0 %97 }
  0xbd   :  { %v172_v61 = vsel %vm170_vm13, %v169_v59, %v98_v43  ;;  %v174_v1 = vsel %vm173_vm14, %v171_v0, %v102_v42  ;;  %v943_v43 = vmov 920167782  }
  0xbe   :  { %v175_v2 = vsel %vm173_vm14, %v172_v61, %v104_v45 }
  0xc4   :  { %v110_v49 = vpop.permute.xlu1 %109  ;;  %v108_v50 = vpop.permute.xlu0 %107 }
  0xc5   :  { %v178_v3 = vsel %vm176_vm15, %v175_v2, %v110_v49  ;;  %v177_v4 = vsel %vm176_vm15, %v174_v1, %v108_v50  ;;  %v945_v50 = vmov 683565275  }
  0xc6   :  { %v180_v8 = vsel %vm179_vm0, %v177_v4, %v114_v55 }
  0xcc   :  { %v120_v62 = vpop.permute.xlu1 %119  ;;  %v116_v63 = vpop.permute.xlu0 %115 }
  0xcd   :  { %v181_v5 = vsel %vm179_vm0, %v178_v3, %v116_v63  ;;  %v183_v9 = vsel %vm182_vm1, %v180_v8, %v120_v62 }
  0xce   :  { %v184_v10 = vsel %vm182_vm1, %v181_v5, %v122_v6 }
  0xd4   :  { %v128_v11 = vpop.permute.xlu1 %127  ;;  %v126_v12 = vpop.permute.xlu0 %125 }
  0xd5   :  { %v187_v13 = vsel %vm185_vm2, %v184_v10, %v128_v11  ;;  %v186_v14 = vsel %vm185_vm2, %v183_v9, %v126_v12 }
  0xd6   :  { %v1040_v15 = vmul.f32 %v896_v7, %v187_v13  ;;  %v1042_v16 = vmul.f32 %v896_v7, %v186_v14 }
  0xd8   :  { %v353_v17 = vand.u32 2139095040, %v1040_v15  ;;  %v198_v18 = vand.u32 2139095040, %v1042_v16  ;;  %v350_v19 = vand.u32 2147483647, %v1040_v15  ;;  %v195_v20 = vand.u32 2147483647, %v1042_v16 }
  0xda   :  { %v354_v21 = vshrl.u32 %v353_v17, 23  ;;  %v199_v22 = vshrl.u32 %v198_v18, 23  ;;  %v357_v23 = vand.u32 8388607, %v350_v19  ;;  %v202_v27 = vand.u32 8388607, %v195_v20 }
  0xdc   :  { %v858_v24 = vadd.s32 4294967169, %v354_v21  ;;  %v855_v25 = vadd.s32 4294967169, %v199_v22  ;;  %v358_v26 = vor.u32 8388608, %v357_v23  ;;  %v203_v33 = vor.u32 8388608, %v202_v27 }
  0xde   :  { %v360_v28 = vadd.s32 1, %v858_v24  ;;  %v205_v29 = vadd.s32 1, %v855_v25  ;;  %v1052_v32 = vshll.u32 %v358_v26, 8  ;;  %v1063_v42 = vshll.u32 %v203_v33, 8 }
  0xe0   :  { %vm361_vm3 = vcmp.gt.s32.totalorder %v360_v28, 0  ;;  %vm206_vm4 = vcmp.gt.s32.totalorder %v205_v29, 0  ;;  %v399_v41 = vand.u32 65535, %v1052_v32  ;;  %v400_v5 = vshrl.u32 %v1052_v32, 16 }
  0xe1   :  { %v362_v30 = vsel %vm361_vm3, %v360_v28, 0  ;;  %v207_v31 = vsel %vm206_vm4, %v205_v29, 0 }
  0xe2   :  { %v1054_v34 = vshrl.u32 %v362_v30, 5  ;;  %v364_v35 = vand.u32 31, %v362_v30  ;;  %v1056_v36 = vand.u32 31, %v207_v31  ;;  %v1079_v3 = vshrl.u32 %v207_v31, 5 }
  0xe4   :  { %v365_v37 = vsub.s32 32, %v364_v35  ;;  %v376_v39 = vshll.u32 %v942_v38, %v364_v35  ;;  %v1060_v40 = vsub.s32 32, %v1056_v36  ;;  %v379_v45 = vshll.u32 %v943_v43, %v364_v35 }
  0xe5   :  { %vm385_vm5 = vcmp.lt.s32.totalorder %v1054_v34, 4  ;;  %v367_v51 = vshll.u32 %v945_v50, %v364_v35  ;;  %v370_v56 = vshll.u32 %v946_v52, %v364_v35  ;;  %v221_v59 = vshll.u32 %v942_v38, %v1056_v36 }
  0xe6   :  { %v377_v44 = vshrl.u32 %v943_v43, %v365_v37  ;;  %v380_v47 = vshrl.u32 %v944_v46, %v365_v37  ;;  %v222_v48 = vshrl.u32 %v943_v43, %v1060_v40  ;;  %v225_v49 = vshrl.u32 %v944_v46, %v1060_v40 }
  0xe7   :  { %v368_v53 = vshrl.u32 %v946_v52, %v365_v37  ;;  %v371_v58 = vshrl.u32 %v947_v57, %v365_v37  ;;  %v373_v61 = vshll.u32 %v947_v57, %v364_v35  ;;  %v374_v62 = vshrl.u32 %v942_v38, %v365_v37 }
  0xe8   :  { %v378_v54 = vor.u32 %v377_v44, %v376_v39  ;;  %v381_v55 = vor.u32 %v380_v47, %v379_v45  ;;  %v224_v1 = vshll.u32 %v943_v43, %v1056_v36  ;;  %vm382_vm6 = vcmp.lt.s32.totalorder %v1054_v34, 1 }
  0xe9   :  { %v369_v60 = vor.u32 %v368_v53, %v367_v51  ;;  %v372_v2 = vor.u32 %v371_v58, %v370_v56  ;;  %v375_v4 = vor.u32 %v374_v62, %v373_v61  ;;  %v1083_v6 = vor.u32 %v222_v48, %v221_v59 }
  0xea   :  { %v391_v63 = vsel %vm385_vm5, %v378_v54, 920167782  ;;  %v395_v0 = vsel %vm385_vm5, %v381_v55, 1326507024  ;;  %v226_v7 = vor.u32 %v225_v49, %v224_v1  ;;  %vm384_vm7 = vcmp.lt.s32.totalorder %v1054_v34, 3 }
  0xeb   :  { %v390_v8 = vsel %vm382_vm6, %v369_v60, %v372_v2  ;;  %vm383_vm9 = vcmp.lt.s32.totalorder %v1054_v34, 2  ;;  %v392_v9 = vsel %vm384_vm7, %v375_v4, %v391_v63  ;;  %v394_v10 = vsel %vm382_vm6, %v372_v2, %v375_v4 }
  0xec   :  { %v396_v11 = vsel %vm384_vm7, %v378_v54, %v395_v0  ;;  %v366_v12 = vshrl.u32 %v945_v50, %v365_v37  ;;  %v387_v13 = vsel %vm385_vm5, %v375_v4, 2102212464  ;;  %v393_v14 = vsel %vm383_vm9, %v390_v8, %v392_v9 }
  0xed   :  { %v397_v17 = vsel %vm383_vm9, %v394_v10, %v396_v11  ;;  %vm230_vm10 = vcmp.lt.s32.totalorder %v1079_v3, 4  ;;  %v423_v22 = vand.u32 65535, %v393_v14  ;;  %v424_v26 = vshrl.u32 %v393_v14, 16 }
  0xee   :  { %v401_v18 = vand.u32 65535, %v397_v17  ;;  %v402_v21 = vshrl.u32 %v397_v17, 16  ;;  %v236_v23 = vsel %vm230_vm10, %v1083_v6, 920167782  ;;  %v240_v24 = vsel %vm230_vm10, %v226_v7, 1326507024 }
  0xef   :  { %v386_v25 = vsel %vm382_vm6, %v366_v12, %v369_v60  ;;  %v388_v27 = vsel %vm384_vm7, %v372_v2, %v387_v13  ;;  %v212_v30 = vshll.u32 %v945_v50, %v1056_v36  ;;  %v426_v31 = vmul.u32 %v424_v26, %v399_v41 }
  0xf0   :  { %v404_v28 = vmul.u32 %v402_v21, %v399_v41  ;;  %v405_v29 = vmul.u32 %v401_v18, %v400_v5  ;;  %v427_v33 = vmul.u32 %v423_v22, %v400_v5  ;;  %v213_v35 = vshrl.u32 %v946_v52, %v1060_v40 }
  0xf1   :  { %v215_v37 = vshll.u32 %v946_v52, %v1056_v36  ;;  %v403_v39 = vmul.u32 %v401_v18, %v399_v41  ;;  %v406_v43 = vmul.u32 %v402_v21, %v400_v5  ;;  %v425_v45 = vmul.u32 %v423_v22, %v399_v41 }
  0xf2   :  { %v407_v44 = vshll.u32 %v404_v28, 16  ;;  %v408_v46 = vshrl.u32 %v404_v28, 16  ;;  %v409_v47 = vshll.u32 %v405_v29, 16  ;;  %v428_v48 = vmul.u32 %v424_v26, %v400_v5 }
  0xf3   :  { %v429_v49 = vshll.u32 %v426_v31, 16  ;;  %v431_v53 = vshll.u32 %v427_v33, 16  ;;  %v216_v54 = vshrl.u32 %v947_v57, %v1060_v40  ;;  %v948_v55 = vmov 0  }
  0xf4   :  { %vm411_vm11 = vc.u32 %v403_v39, %v407_v44  ;;  %v413_v51 = vadd.s32 %v407_v44, %v403_v39  ;;  %v1119_v52 = vor.u32 %v213_v35, %v212_v30  ;;  %v410_v61 = vshrl.u32 %v405_v29, 16 }
  0xf5   :  { %v412_v56 = vsel %vm411_vm11, 1, %v948_v55  ;;  %vm433_vm12 = vc.u32 %v425_v45, %v429_v49  ;;  %v435_v58 = vadd.s32 %v429_v49, %v425_v45  ;;  %v1122_v60 = vor.u32 %v216_v54, %v215_v37 }
  0xf6   :  { %v414_v59 = vadd.s32 %v412_v56, %v406_v43  ;;  %vm415_vm13 = vc.u32 %v413_v51, %v409_v47  ;;  %v434_v41 = vsel %vm433_vm12, 1, %v948_v55  ;;  %v218_v2 = vshll.u32 %v947_v57, %v1056_v36 }
  0xf7   :  { %v416_v62 = vsel %vm415_vm13, 1, %v948_v55  ;;  %v436_v63 = vadd.s32 %v434_v41, %v428_v48  ;;  %vm437_vm14 = vc.u32 %v435_v58, %v431_v53  ;;  %v219_v4 = vshrl.u32 %v942_v38, %v1060_v40 }
  0xf8   :  { %v418_v0 = vadd.s32 %v416_v62, %v414_v59  ;;  %v438_v1 = vsel %vm437_vm14, 1, %v948_v55  ;;  %v430_v5 = vshrl.u32 %v426_v31, 16  ;;  %vm227_vm15 = vcmp.lt.s32.totalorder %v1079_v3, 1 }
  0xf9   :  { %v440_v7 = vadd.s32 %v438_v1, %v436_v63  ;;  %vm229_vm0 = vcmp.lt.s32.totalorder %v1079_v3, 3  ;;  %v220_v9 = vor.u32 %v219_v4, %v218_v2  ;;  %v235_v10 = vsel %vm227_vm15, %v1119_v52, %v1122_v60 }
  0xfa   :  { %v419_v8 = vadd.s32 %v418_v0, %v408_v46  ;;  %v241_v36 = vsel %vm229_vm0, %v1083_v6, %v240_v24  ;;  %v432_v57 = vshrl.u32 %v427_v33, 16  ;;  %v1139_v11 = vadd.s32 %v435_v58, %v431_v53 }
  0xfb   :  { %v441_v38 = vadd.s32 %v440_v7, %v430_v5  ;;  %vm228_vm1 = vcmp.lt.s32.totalorder %v1079_v3, 2  ;;  %v237_v13 = vsel %vm229_vm0, %v220_v9, %v236_v23  ;;  %v239_v14 = vsel %vm227_vm15, %v1122_v60, %v220_v9 }
  0xfc   :  { %v1141_v12 = vadd.s32 %v419_v8, %v410_v61  ;;  %v389_v17 = vsel %vm383_vm9, %v386_v25, %v388_v27  ;;  %v238_v6 = vsel %vm228_vm1, %v235_v10, %v237_v13  ;;  %v242_v21 = vsel %vm228_vm1, %v239_v14, %v241_v36 }
  0xfd   :  { %v442_v18 = vadd.s32 %v441_v38, %v432_v57  ;;  %v244_v22 = vand.u32 65535, %v1063_v42  ;;  %v245_v23 = vshrl.u32 %v1063_v42, 16  ;;  %v246_v24 = vand.u32 65535, %v242_v21 }
  0xfe   :  { %vm445_vm2 = vc.u32 %v1141_v12, %v1139_v11  ;;  %v247_v28 = vshrl.u32 %v242_v21, 16  ;;  %v268_v29 = vand.u32 65535, %v238_v6  ;;  %v269_v34 = vshrl.u32 %v238_v6, 16 }
  0xff   :  { %v446_v26 = vadd.s32 1, %v442_v18  ;;  %v443_v25 = vmul.u32 %v1052_v32, %v389_v17  ;;  %v250_v31 = vmul.u32 %v246_v24, %v245_v23  ;;  %v248_v37 = vmul.u32 %v246_v24, %v244_v22 }
 0x100   :  { %v249_v30 = vmul.u32 %v247_v28, %v244_v22  ;;  %v271_v35 = vmul.u32 %v269_v34, %v244_v22  ;;  %v272_v43 = vmul.u32 %v268_v29, %v245_v23  ;;  %v251_v45 = vmul.u32 %v247_v28, %v245_v23 }
 0x101   :  { %v447_v27 = vsel %vm445_vm2, %v446_v26, %v442_v18  ;;  %v270_v46 = vmul.u32 %v268_v29, %v244_v22  ;;  %v254_v48 = vshll.u32 %v250_v31, 16  ;;  %v273_v51 = vmul.u32 %v269_v34, %v245_v23 }
 0x102   :  { %v448_v33 = vadd.s32 %v447_v27, %v443_v25  ;;  %v252_v39 = vshll.u32 %v249_v30, 16  ;;  %v274_v47 = vshll.u32 %v271_v35, 16  ;;  %v276_v58 = vshll.u32 %v272_v43, 16 }
 0x103   :  { %v232_v63 = vsel %vm230_vm10, %v220_v9, 2102212464  ;;  %v253_v0 = vshrl.u32 %v249_v30, 16  ;;  %v211_v4 = vshrl.u32 %v945_v50, %v1060_v40  ;;  %v255_v7 = vshrl.u32 %v250_v31, 16 }
 0x104   :  { %v449_v44 = vadd.s32 536870912, %v448_v33  ;;  %vm256_vm3 = vc.u32 %v248_v37, %v252_v39  ;;  %v258_v49 = vadd.s32 %v252_v39, %v248_v37  ;;  %vm278_vm4 = vc.u32 %v270_v46, %v274_v47 }
 0x105   :  { %v257_v32 = vsel %vm256_vm3, 1, %v948_v55  ;;  %v280_v54 = vadd.s32 %v274_v47, %v270_v46  ;;  %v279_v59 = vsel %vm278_vm4, 1, %v948_v55  ;;  %v275_v10 = vshrl.u32 %v271_v35, 16 }
 0x106   :  { %v1160_v53 = vshrl.u32 %v449_v44, 30  ;;  %v259_v56 = vadd.s32 %v257_v32, %v251_v45  ;;  %vm260_vm5 = vc.u32 %v258_v49, %v254_v48  ;;  %v281_v62 = vadd.s32 %v279_v59, %v273_v51 }
 0x107   :  { %v261_v61 = vsel %vm260_vm5, 1, %v948_v55  ;;  %vm282_vm6 = vc.u32 %v280_v54, %v276_v58  ;;  %v231_v38 = vsel %vm227_vm15, %v211_v4, %v1119_v52  ;;  %v233_v9 = vsel %vm229_vm0, %v1122_v60, %v232_v63 }
 0x108   :  { %v451_v41 = vshll.u32 %v1160_v53, 30  ;;  %v263_v1 = vadd.s32 %v261_v61, %v259_v56  ;;  %v283_v5 = vsel %vm282_vm6, 1, %v948_v55  ;;  %v277_v14 = vshrl.u32 %v272_v43, 16 }
 0x109   :  { %v285_v36 = vadd.s32 %v283_v5, %v281_v62  ;;  %v284_v50 = vadd.s32 %v280_v54, %v276_v58  ;;  %v234_v18 = vsel %vm228_vm1, %v231_v38, %v233_v9  ;;  %v444_v60 = vadd.s32 %v1139_v11, %v1141_v12 }
 0x10a   :  { %v452_v2 = vsub.s32 %v448_v33, %v451_v41  ;;  %v264_v8 = vadd.s32 %v263_v1, %v253_v0  ;;  %v288_v23 = vmul.u32 %v1063_v42, %v234_v18  ;;  %vm352_vm12 = vcmp.lt.s32.totalorder %v1040_v15, 0 }
 0x10b   :  { %v286_v17 = vadd.s32 %v285_v36, %v275_v10  ;;  %vm1188_vm13 = vcmp.le.f32.partialorder %v350_v19, 0.7853982  ;;  %v474_v51 = vsub.s32 4, %v1160_v53  ;;  %vm1207_vm15 = vcmp.le.f32.partialorder %v195_v20, 0.7853982 }
 0x10c   :  { %vm453_vm7 = vcmp.lt.s32.totalorder %v452_v2, 0  ;;  %v454_v57 = vsub.s32 0, %v452_v2  ;;  %v265_v13 = vadd.s32 %v264_v8, %v255_v7  ;;  %vm197_vm0 = vcmp.lt.s32.totalorder %v1042_v16, 0 }
 0x10d   :  { %v287_v6 = vadd.s32 %v286_v17, %v277_v14  ;;  %v475_v19 = vsel %vm352_vm12, %v474_v51, %v1160_v53  ;;  %vm493_vm4 = vweird.f32 %v1040_v15 }
 0x10e   :  { %v455_v40 = vsel %vm453_vm7, %v454_v57, %v452_v2  ;;  %vm290_vm9 = vc.u32 %v265_v13, %v284_v50  ;;  %v289_v41 = vadd.s32 %v284_v50, %v265_v13  ;;  %v477_v5 = vsel %vm1188_vm13, 0, %v475_v19 }
 0x10f   :  { %v456_v55 = vclz %v455_v40  ;;  %v291_v22 = vadd.s32 1, %v287_v6  ;;  %v494_v9 = vadd.s32 3, %v477_v5 }
 0x111   :  { %v859_v21 = vadd.s32 4294967294, %v456_v55  ;;  %v292_v52 = vsel %vm290_vm9, %v291_v22, %v287_v6  ;;  %v495_v18 = vand.u32 3, %v494_v9 }
 0x112   :  { %v293_v26 = vadd.s32 %v292_v52, %v288_v23 }
 0x113   :  { %vm860_vm10 = vcmp.lt.s32.totalorder %v859_v21, 0  ;;  %vm496_vm1 = vcmp.lt.s32.totalorder %v495_v18, 2  ;;  %vm497_vm2 = vcmp.eq.s32.totalorder %v495_v18, 0  ;;  %vm500_vm3 = vcmp.eq.s32.totalorder %v495_v18, 2 }
 0x114   :  { %v459_v24 = vsel %vm860_vm10, 0, %v859_v21  ;;  %v294_v34 = vadd.s32 536870912, %v293_v26 }
 0x115   :  { %v460_v28 = vsub.s32 32, %v459_v24  ;;  %v464_v29 = vsub.s32 4294967266, %v459_v24  ;;  %v461_v25 = vshll.u32 %v452_v2, %v459_v24 }
 0x116   :  { %v1182_v30 = vshrl.u32 %v294_v34, 30 }
 0x117   :  { %v462_v27 = vshrl.u32 %v444_v60, %v460_v28  ;;  %v465_v3 = vadd.s32 127, %v464_v29 }
 0x118   :  { %v296_v35 = vshll.u32 %v1182_v30, 30  ;;  %v319_v29 = vsub.s32 4, %v1182_v30 }
 0x119   :  { %v463_v31 = vor.u32 %v462_v27, %v461_v25  ;;  %v466_v33 = vshll.u32 %v465_v3, 23 }
 0x11a   :  { %v297_v37 = vsub.s32 %v293_v26, %v296_v35 }
 0x11b   :  { %v467_v42 = vor.u32 4788187, %v466_v33  ;;  %v470_v43 = vcvt.s32.f32 %v463_v31  ;;  %v320_v33 = vsel %vm197_vm0, %v319_v29, %v1182_v30  ;;  %v814_v30 = vand.u32 3, %v477_v5 }
 0x11c   :  { %vm298_vm11 = vcmp.lt.s32.totalorder %v297_v37, 0  ;;  %v299_v44 = vsub.s32 0, %v297_v37 }
 0x11d   :  { %v468_v39 = vand.u32 2147483647, %v467_v42 }
 0x11e   :  { %v300_v11 = vsel %vm298_vm11, %v299_v44, %v297_v37 }
 0x11f   :  { %v471_v45 = vmul.f32 %v470_v43, %v468_v39  ;;  %v301_v46 = vclz %v300_v11 }
 0x121   :  { %v472_v12 = vxor.u32 2147483648, %v471_v45  ;;  %v856_v49 = vadd.s32 4294967294, %v301_v46 }
 0x123   :  { %v473_v48 = vsel %vm352_vm12, %v472_v12, %v471_v45  ;;  %vm857_vm14 = vcmp.lt.s32.totalorder %v856_v49, 0  ;;  %vm338_vm12 = vweird.f32 %v1042_v16 }
 0x124   :  { %v476_v32 = vsel %vm1188_vm13, %v1040_v15, %v473_v48  ;;  %v304_v56 = vsel %vm857_vm14, 0, %v856_v49  ;;  %vm816_vm13 = vcmp.eq.s32.totalorder %v814_v30, 0  ;;  %vm819_vm14 = vcmp.eq.s32.totalorder %v814_v30, 2 }
 0x125   :  { %v478_v54 = vmul.f32 %v476_v32, %v476_v32  ;;  %v305_v61 = vsub.s32 32, %v304_v56  ;;  %v309_v62 = vsub.s32 4294967266, %v304_v56  ;;  %v306_v2 = vshll.u32 %v297_v37, %v304_v56 }
 0x126   :  { %v322_v37 = vsel %vm1207_vm15, 0, %v320_v33 }
 0x127   :  { %v479_v58 = vmul.f32 -0.001358992, %v478_v54  ;;  %v486_v59 = vmul.f32 -0.00019511016, %v478_v54  ;;  %v307_v1 = vshrl.u32 %v289_v41, %v305_v61  ;;  %v310_v4 = vadd.s32 127, %v309_v62 }
 0x128   :  { %v339_v11 = vadd.s32 3, %v322_v37  ;;  %v660_v49 = vand.u32 3, %v322_v37 }
 0x129   :  { %v480_v63 = vadd.f32 0.041655596, %v479_v58  ;;  %v487_v0 = vadd.f32 0.008332121, %v486_v59  ;;  %v308_v10 = vor.u32 %v307_v1, %v306_v2  ;;  %v311_v36 = vshll.u32 %v310_v4, 23 }
 0x12a   :  { %v340_v51 = vand.u32 3, %v339_v11  ;;  %vm661_vm5 = vcmp.lt.s32.totalorder %v660_v49, 2  ;;  %vm662_vm6 = vcmp.eq.s32.totalorder %v660_v49, 0  ;;  %vm665_vm7 = vcmp.eq.s32.totalorder %v660_v49, 2 }
 0x12b   :  { %v481_v7 = vmul.f32 %v480_v63, %v478_v54  ;;  %v488_v8 = vmul.f32 %v487_v0, %v478_v54  ;;  %v312_v13 = vor.u32 4788187, %v311_v36  ;;  %v315_v40 = vcvt.s32.f32 %v308_v10 }
 0x12c   :  { %vm341_vm9 = vcmp.lt.s32.totalorder %v340_v51, 2  ;;  %vm342_vm10 = vcmp.eq.s32.totalorder %v340_v51, 0  ;;  %vm345_vm11 = vcmp.eq.s32.totalorder %v340_v51, 2 }
 0x12d   :  { %v482_v57 = vadd.f32 -0.4999988, %v481_v7  ;;  %v489_v38 = vadd.f32 -0.16666654, %v488_v8  ;;  %v313_v53 = vand.u32 2147483647, %v312_v13 }
 0x12f   :  { %v483_v14 = vmul.f32 %v482_v57, %v478_v54  ;;  %v490_v17 = vmul.f32 %v489_v38, %v478_v54  ;;  %v316_v6 = vmul.f32 %v315_v40, %v313_v53 }
 0x131   :  { %v1199_v50 = vadd.f32 1.0, %v483_v14  ;;  %v491_v55 = vadd.f32 1.0, %v490_v17  ;;  %v317_v23 = vxor.u32 2147483648, %v316_v6 }
 0x133   :  { %v1201_v21 = vmul.f32 %v491_v55, %v476_v32  ;;  %v501_v22 = vxor.u32 2147483648, %v1199_v50  ;;  %v318_v26 = vsel %vm197_vm0, %v317_v23, %v316_v6  ;;  %vm513_vm0 = vcmask 687136  }
 0x134   :  { %v321_v20 = vsel %vm1207_vm15, %v1042_v16, %v318_v26  ;;  %vm815_vm15 = vcmp.lt.s32.totalorder %v814_v30, 2 }
 0x135   :  { %v498_v52 = vxor.u32 2147483648, %v1201_v21  ;;  %v502_v28 = vsel %vm500_vm3, %v501_v22, %v1201_v21  ;;  %v323_v25 = vmul.f32 %v321_v20, %v321_v20  ;;  %v821_v2 = vsel %vm819_vm14, %v501_v22, %v1201_v21 }
 0x137   :  { %v499_v60 = vsel %vm497_vm2, %v1199_v50, %v498_v52  ;;  %v324_v3 = vmul.f32 -0.001358992, %v323_v25  ;;  %v331_v31 = vmul.f32 -0.00019511016, %v323_v25  ;;  %v818_v1 = vsel %vm816_vm13, %v1199_v50, %v498_v52 }
 0x138   :  { %v503_v34 = vsel %vm496_vm1, %v499_v60, %v502_v28  ;;  %v822_v4 = vsel %vm815_vm15, %v818_v1, %v821_v2  ;;  %vm832_vm1 = vcmask 1048224  }
 0x139   :  { %v504_v27 = vsel %vm493_vm4, nan, %v503_v34  ;;  %v325_v35 = vadd.f32 0.041655596, %v324_v3  ;;  %v332_v42 = vadd.f32 0.008332121, %v331_v31  ;;  %v823_v5 = vsel %vm493_vm4, nan, %v822_v4 }
 0x13a   :  { %509 = vrot.lane.b32.xlu0 %v504_v27, %s924_s12 }
 0x13b   :  { %v326_v39 = vmul.f32 %v325_v35, %v323_v25  ;;  %v333_v43 = vmul.f32 %v332_v42, %v323_v25 }
 0x13d   :  { %v327_v44 = vadd.f32 -0.4999988, %v326_v39  ;;  %v334_v45 = vadd.f32 -0.16666654, %v333_v43 }
 0x13f   :  { %v328_v12 = vmul.f32 %v327_v44, %v323_v25  ;;  %v335_v46 = vmul.f32 %v334_v45, %v323_v25 }
 0x141   :  { %v329_v47 = vadd.f32 1.0, %v328_v12  ;;  %v336_v48 = vadd.f32 1.0, %v335_v46 }
 0x143   :  { %v337_v32 = vmul.f32 %v336_v48, %v321_v20  ;;  %v346_v54 = vxor.u32 2147483648, %v329_v47 }
 0x145   :  { %v343_v56 = vxor.u32 2147483648, %v337_v32  ;;  %v667_v59 = vsel %vm665_vm7, %v346_v54, %v337_v32  ;;  %v347_v61 = vsel %vm345_vm11, %v346_v54, %v337_v32 }
 0x147   :  { %v664_v58 = vsel %vm662_vm6, %v329_v47, %v343_v56  ;;  %v344_v41 = vsel %vm342_vm10, %v329_v47, %v343_v56 }
 0x148   :  { %v668_v19 = vsel %vm661_vm5, %v664_v58, %v667_v59  ;;  %v348_v62 = vsel %vm341_vm9, %v344_v41, %v347_v61 }
 0x149   :  { %v669_v63 = vsel %vm338_vm12, nan, %v668_v19  ;;  %v349_v0 = vsel %vm338_vm12, nan, %v348_v62 }
 0x14a   :  { %826 = vrot.lane.b32.xlu1 %v669_v63, %s949_s1  ;;  %507 = vrot.lane.b32.xlu2 %v349_v0, %s924_s12 }
 0x152   :  { %828 = vrot.lane.b32.xlu2 %v823_v5, %s949_s1 }
 0x1a4   :  { %v508_v16 = vpop.permute.xlu2 %507 }
 0x1a5   :  { %514 = vst.msk [vmem:[#allocation2] sm:$0xff] %vm513_vm0, %v508_v16 }
 0x1ac   :  { %v510_v7 = vpop.permute.xlu0 %509  ;;  %v829_v8 = vpop.permute.xlu2 %828 }
 0x1ad   :  { %515 = vst.msk [vmem:[#allocation2 + $0x10] sm:$0xff] %vm513_vm0, %v510_v7 }
 0x1ae   :  { %836 = vst.msk [vmem:[#allocation2 + $0x18] sm:$0xff] %vm155_vm8, %v829_v8 }
 0x1af   :  { %835 = vst.msk [vmem:[#allocation2 + $0x10] sm:$0xff] %vm832_vm1, %v829_v8 }
 0x1bc   :  { %v827_v15 = vpop.permute.xlu1 %826 }
 0x1bd   :  { %833 = vst.msk [vmem:[#allocation2] sm:$0xff] %vm832_vm1, %v827_v15 }
 0x1be   :  { %834 = vst.msk [vmem:[#allocation2 + $0x8] sm:$0xff] %vm155_vm8, %v827_v15 }
 0x1bf   :  { %849 = dma.vmem_to_hbm [thread:$0]  %s842_s6, 512, %s844_s9, [#allocation3], %s951_s10, %s951_s10, %s926_s16  }
 0x1c0   :  { %921 = dma.done.wait [#allocation3], 512  }
 0x1c1   :  { %922 = vsyncadd [#allocation3], 4294966784 }
 0x1c2   :  { %854 = vsyncpa [#allocation3], 1 }

</bundles_post_ra>
